<compile_context>
chip_gen: v7x
topology: tpu7x:2x2x1
jax: 0.10.0
libtpu: 0.0.40
codegen_flags: <defaults>
</compile_context>

<pallas_src>
import functools

import jax
import jax.numpy as jnp
from jax.experimental import pallas as pl
from jax.experimental.pallas import tpu as pltpu


def _round_up(n: int, m: int) -> int:
    return ((n + m - 1) // m) * m


def _mlp_kernel(x_ref, w1_ref, b1_ref, w2_ref, b2_ref, w3_ref, b3_ref, o_ref):
    """Fused fc1->relu->fc2->relu->fc3 on one batch tile (weights VMEM-resident)."""
    x = x_ref[...]

    # fc1 + ReLU   (TB, D_in) @ (D_in, 512)
    h1 = jnp.dot(x, w1_ref[...], preferred_element_type=jnp.float32)
    h1 = jnp.maximum(h1 + b1_ref[...].astype(jnp.float32), 0.0)

    # fc2 + ReLU   (TB, 512) @ (512, 128)   [124 padded to 128 lanes]
    h2 = jnp.dot(h1.astype(w2_ref.dtype), w2_ref[...], preferred_element_type=jnp.float32)
    h2 = jnp.maximum(h2 + b2_ref[...].astype(jnp.float32), 0.0)

    # fc3 (no activation)   (TB, 128) @ (128, D_out_pad)
    out = jnp.dot(h2.astype(w3_ref.dtype), w3_ref[...], preferred_element_type=jnp.float32)
    out = out + b3_ref[...].astype(jnp.float32)

    o_ref[...] = out.astype(o_ref.dtype)


@functools.partial(jax.jit, static_argnames=("block_b", "compute_dtype"))
def fully_connected_block(x, w1, b1, w2, b2, w3, b3, *, block_b=512, compute_dtype=None):
    """Pallas-backed forward pass of FullyConnectedBlock.

    x: (B, input_dim) f32.  Weights (in, out), biases (1, out).
    block_b: batch rows per grid step (sweep 512/1024 for large B).
    compute_dtype: optional MXU operand dtype (e.g. jnp.bfloat16); accumulation
                   stays f32 inside the kernel.
    """
    out_dtype = x.dtype
    B, d_in = x.shape
    h1_dim = w1.shape[1]        # 512
    h2_dim = w2.shape[1]        # 124
    d_out = w3.shape[1]

    # --- Lane padding: 124-wide hidden -> 128, output -> multiple of 128 -------
    h2_pad = _round_up(h2_dim, 128)
    d_out_pad = _round_up(d_out, 128)
    if h2_pad != h2_dim:
        w2 = jnp.pad(w2, ((0, 0), (0, h2_pad - h2_dim)))
        b2 = jnp.pad(b2, ((0, 0), (0, h2_pad - h2_dim)))
        w3 = jnp.pad(w3, ((0, h2_pad - h2_dim), (0, 0)))
    if d_out_pad != d_out:
        w3 = jnp.pad(w3, ((0, 0), (0, d_out_pad - d_out)))
        b3 = jnp.pad(b3, ((0, 0), (0, d_out_pad - d_out)))

    # --- Optional reduced-precision MXU operands (f32 accumulate in-kernel) ----
    if compute_dtype is not None:
        x = x.astype(compute_dtype)
        w1, b1, w2, b2, w3, b3 = (a.astype(compute_dtype) for a in (w1, b1, w2, b2, w3, b3))

    # --- Batch tiling (pad ragged last tile with zero rows, slice afterwards) --
    tb = min(block_b, _round_up(B, 8))
    b_pad = _round_up(B, tb)
    if b_pad != B:
        x = jnp.pad(x, ((0, b_pad - B), (0, 0)))
    grid = (b_pad // tb,)

    # --- Cost hint for the XLA scheduler ---------------------------------------
    x_item = jnp.dtype(x.dtype).itemsize
    w_item = jnp.dtype(w1.dtype).itemsize
    flops = 2 * B * (d_in * h1_dim + h1_dim * h2_pad + h2_pad * d_out_pad)
    bytes_accessed = (
        b_pad * d_in * x_item                       # x stream in
        + b_pad * d_out_pad * jnp.dtype(out_dtype).itemsize   # out stream
        + (d_in * h1_dim + h1_dim
           + h1_dim * h2_pad + h2_pad
           + h2_pad * d_out_pad + d_out_pad) * w_item          # resident weights
    )

    def tile_spec(shape):
        return pl.BlockSpec(shape, lambda i: (i, 0))

    def resident_spec(shape):
        return pl.BlockSpec(shape, lambda i: (0, 0))

    out_padded = pl.pallas_call(
        _mlp_kernel,
        out_shape=jax.ShapeDtypeStruct((b_pad, d_out_pad), out_dtype),
        grid=grid,
        in_specs=[
            tile_spec((tb, d_in)),            # x: streamed per batch tile
            resident_spec((d_in, h1_dim)),    # w1
            resident_spec((1, h1_dim)),       # b1
            resident_spec((h1_dim, h2_pad)),  # w2 (padded to 128 cols)
            resident_spec((1, h2_pad)),       # b2
            resident_spec((h2_pad, d_out_pad)),  # w3 (padded rows/cols)
            resident_spec((1, d_out_pad)),    # b3
        ],
        out_specs=tile_spec((tb, d_out_pad)),
        compiler_params=pltpu.CompilerParams(
            dimension_semantics=("parallel",),   # megacore sharding on v7x
        ),
        cost_estimate=pl.CostEstimate(
            flops=flops, transcendentals=0, bytes_accessed=bytes_accessed
        ),
    )(x, w1, b1, w2, b2, w3, b3)

    return out_padded[:B, :d_out]


def init_params(key, input_dim, output_dim, dtype=jnp.float32):
    """Deterministic init mimicking PyTorch nn.Linear default (U[-1/sqrt(fan_in), ...])."""
    def linear_init(k, fan_in, fan_out):
        kw, kb = jax.random.split(k)
        bound = 1.0 / jnp.sqrt(fan_in)
        w = jax.random.uniform(kw, (fan_in, fan_out), dtype, -bound, bound)
        b = jax.random.uniform(kb, (1, fan_out), dtype, -bound, bound)
        return w, b

    k1, k2, k3 = jax.random.split(key, 3)
    w1, b1 = linear_init(k1, input_dim, 512)
    w2, b2 = linear_init(k2, 512, 124)
    w3, b3 = linear_init(k3, 124, output_dim)
    return w1, b1, w2, b2, w3, b3


def reference_forward(x, w1, b1, w2, b2, w3, b3):
    h1 = jax.nn.relu(x @ w1 + b1)
    h2 = jax.nn.relu(h1 @ w2 + b2)
    return h2 @ w3 + b3


if __name__ == "__main__":
    key = jax.random.PRNGKey(0)
    k_x, k_p = jax.random.split(key)

    batch = 8
    input_dim = 32
    output_dim = 10

    x = jax.random.normal(k_x, (batch, input_dim), dtype=jnp.float32)
    params = init_params(k_p, input_dim, output_dim)

    out = fully_connected_block(x, *params)
    out = jax.block_until_ready(out)

    # Sanity check against a pure-JAX reference of the same math (f32 path).
    ref = reference_forward(x, *params)
    assert out.shape == (batch, output_dim)
    assert jnp.allclose(out, ref, atol=1e-4, rtol=1e-4)

    print("KERNEL_OK")
</pallas_src>

<mosaic_0001>
module attributes {stable_mosaic.version = 11 : i64} {
  func.func @_mlp_kernel(%arg0: i32, %arg1: memref<8x32xf32, #tpu.memory_space<vmem>>, %arg2: memref<32x512xf32, #tpu.memory_space<vmem>>, %arg3: memref<1x512xf32, #tpu.memory_space<vmem>>, %arg4: memref<512x128xf32, #tpu.memory_space<vmem>>, %arg5: memref<1x128xf32, #tpu.memory_space<vmem>>, %arg6: memref<128x128xf32, #tpu.memory_space<vmem>>, %arg7: memref<1x128xf32, #tpu.memory_space<vmem>>, %arg8: memref<8x128xf32, #tpu.memory_space<vmem>>) attributes {dimension_semantics = [#tpu.dimension_semantics<parallel>], iteration_bounds = array<i64: 1>, scalar_prefetch = 0 : i64, scratch_operands = 0 : i64, tpu.core_type = #tpu.core_type<tc>, window_params = [{transform_indices = @transform_0, window_bounds = array<i64: 8, 32>}, {pipeline_mode = #tpu.pipeline_mode<synchronous>, transform_indices = @transform_1, window_bounds = array<i64: 32, 512>}, {pipeline_mode = #tpu.pipeline_mode<synchronous>, transform_indices = @transform_2, window_bounds = array<i64: 1, 512>}, {pipeline_mode = #tpu.pipeline_mode<synchronous>, transform_indices = @transform_3, window_bounds = array<i64: 512, 128>}, {pipeline_mode = #tpu.pipeline_mode<synchronous>, transform_indices = @transform_4, window_bounds = array<i64: 1, 128>}, {pipeline_mode = #tpu.pipeline_mode<synchronous>, transform_indices = @transform_5, window_bounds = array<i64: 128, 128>}, {pipeline_mode = #tpu.pipeline_mode<synchronous>, transform_indices = @transform_6, window_bounds = array<i64: 1, 128>}, {transform_indices = @transform_7, window_bounds = array<i64: 8, 128>}]} {
    %c0 = arith.constant 0 : index
    %c0_0 = arith.constant 0 : index
    %0 = vector.load %arg1[%c0, %c0_0] : memref<8x32xf32, #tpu.memory_space<vmem>>, vector<8x32xf32>
    %c0_1 = arith.constant 0 : index
    %c0_2 = arith.constant 0 : index
    %1 = vector.load %arg2[%c0_1, %c0_2] : memref<32x512xf32, #tpu.memory_space<vmem>>, vector<32x512xf32>
    %cst = arith.constant dense<0.000000e+00> : vector<8x512xf32>
    %2 = tpu.matmul %0, %1, %cst {dimension_numbers = #tpu.dot_dimension_numbers<[1], [0], [0], [1], [0, 0, 1, 1], [], []>} : vector<8x32xf32>, vector<32x512xf32>, vector<8x512xf32> -> vector<8x512xf32>
    %c0_3 = arith.constant 0 : index
    %c0_4 = arith.constant 0 : index
    %3 = vector.load %arg3[%c0_3, %c0_4] : memref<1x512xf32, #tpu.memory_space<vmem>>, vector<1x512xf32>
    %4 = vector.broadcast %3 : vector<1x512xf32> to vector<8x512xf32>
    %5 = arith.addf %2, %4 : vector<8x512xf32>
    %cst_5 = arith.constant 0.000000e+00 : f32
    %6 = vector.broadcast %cst_5 : f32 to vector<8x512xf32>
    %7 = arith.maximumf %5, %6 : vector<8x512xf32>
    %c0_6 = arith.constant 0 : index
    %c0_7 = arith.constant 0 : index
    %8 = vector.load %arg4[%c0_6, %c0_7] : memref<512x128xf32, #tpu.memory_space<vmem>>, vector<512x128xf32>
    %cst_8 = arith.constant dense<0.000000e+00> : vector<8x128xf32>
    %9 = tpu.matmul %7, %8, %cst_8 {dimension_numbers = #tpu.dot_dimension_numbers<[1], [0], [0], [1], [0, 0, 1, 1], [], []>} : vector<8x512xf32>, vector<512x128xf32>, vector<8x128xf32> -> vector<8x128xf32>
    %c0_9 = arith.constant 0 : index
    %c0_10 = arith.constant 0 : index
    %10 = vector.load %arg5[%c0_9, %c0_10] : memref<1x128xf32, #tpu.memory_space<vmem>>, vector<1x128xf32>
    %11 = vector.broadcast %10 : vector<1x128xf32> to vector<8x128xf32>
    %12 = arith.addf %9, %11 : vector<8x128xf32>
    %cst_11 = arith.constant 0.000000e+00 : f32
    %13 = vector.broadcast %cst_11 : f32 to vector<8x128xf32>
    %14 = arith.maximumf %12, %13 : vector<8x128xf32>
    %c0_12 = arith.constant 0 : index
    %c0_13 = arith.constant 0 : index
    %15 = vector.load %arg6[%c0_12, %c0_13] : memref<128x128xf32, #tpu.memory_space<vmem>>, vector<128x128xf32>
    %cst_14 = arith.constant dense<0.000000e+00> : vector<8x128xf32>
    %16 = tpu.matmul %14, %15, %cst_14 {dimension_numbers = #tpu.dot_dimension_numbers<[1], [0], [0], [1], [0, 0, 1, 1], [], []>} : vector<8x128xf32>, vector<128x128xf32>, vector<8x128xf32> -> vector<8x128xf32>
    %c0_15 = arith.constant 0 : index
    %c0_16 = arith.constant 0 : index
    %17 = vector.load %arg7[%c0_15, %c0_16] : memref<1x128xf32, #tpu.memory_space<vmem>>, vector<1x128xf32>
    %18 = vector.broadcast %17 : vector<1x128xf32> to vector<8x128xf32>
    %19 = arith.addf %16, %18 : vector<8x128xf32>
    %c0_17 = arith.constant 0 : index
    %c0_18 = arith.constant 0 : index
    %20 = vector.load %arg8[%c0_17, %c0_18] : memref<8x128xf32, #tpu.memory_space<vmem>>, vector<8x128xf32>
    tpu.vector_store %arg8[%c0_17, %c0_18], %19 {strides = array<i32>} : memref<8x128xf32, #tpu.memory_space<vmem>>, vector<8x128xf32>,
    return
  }
  func.func @transform_0(%arg0: i32) -> (i32, i32) {
    %c0_i32 = arith.constant 0 : i32
    %c0_i32_0 = arith.constant 0 : i32
    return %arg0, %c0_i32 : i32, i32
  }
  func.func @transform_1(%arg0: i32) -> (i32, i32) {
    %c0_i32 = arith.constant 0 : i32
    %c0_i32_0 = arith.constant 0 : i32
    %c0_i32_1 = arith.constant 0 : i32
    return %c0_i32, %c0_i32_0 : i32, i32
  }
  func.func @transform_2(%arg0: i32) -> (i32, i32) {
    %c0_i32 = arith.constant 0 : i32
    %c0_i32_0 = arith.constant 0 : i32
    %c0_i32_1 = arith.constant 0 : i32
    return %c0_i32, %c0_i32_0 : i32, i32
  }
  func.func @transform_3(%arg0: i32) -> (i32, i32) {
    %c0_i32 = arith.constant 0 : i32
    %c0_i32_0 = arith.constant 0 : i32
    %c0_i32_1 = arith.constant 0 : i32
    return %c0_i32, %c0_i32_0 : i32, i32
  }
  func.func @transform_4(%arg0: i32) -> (i32, i32) {
    %c0_i32 = arith.constant 0 : i32
    %c0_i32_0 = arith.constant 0 : i32
    %c0_i32_1 = arith.constant 0 : i32
    return %c0_i32, %c0_i32_0 : i32, i32
  }
  func.func @transform_5(%arg0: i32) -> (i32, i32) {
    %c0_i32 = arith.constant 0 : i32
    %c0_i32_0 = arith.constant 0 : i32
    %c0_i32_1 = arith.constant 0 : i32
    return %c0_i32, %c0_i32_0 : i32, i32
  }
  func.func @transform_6(%arg0: i32) -> (i32, i32) {
    %c0_i32 = arith.constant 0 : i32
    %c0_i32_0 = arith.constant 0 : i32
    %c0_i32_1 = arith.constant 0 : i32
    return %c0_i32, %c0_i32_0 : i32, i32
  }
  func.func @transform_7(%arg0: i32) -> (i32, i32) {
    %c0_i32 = arith.constant 0 : i32
    %c0_i32_0 = arith.constant 0 : i32
    return %arg0, %c0_i32 : i32, i32
  }
}

</mosaic_0001>

<bundles_post_ra>
// kernel: fully_connected_block.1
= control target key start
LH: loop header
LB: loop body
LE: loop exit
PB: predicated region body
PF: predicated region fallthrough
CT: control target
= control target key end

     0   :  { %v794_v7 = vmov 0.0   ;;  %vm66_vm0 = vcmask 261120   ;;  %s1155_s0 = inlined_call_operand.vmem [shape: f32[8,32], index: 0, kind: input, shape index: {}]   ;;  %s1156_s1 = inlined_call_operand.vmem [shape: f32[32,512], index: 1, kind: input, shape index: {}]   ;;  %s1157_s2 = inlined_call_operand.vmem [shape: f32[1,512], index: 2, kind: input, shape index: {}]   ;;  %s1158_s3 = inlined_call_operand.vmem [shape: f32[512,128], index: 3, kind: input, shape index: {}]   ;;  %s1159_s4 = inlined_call_operand.vmem [shape: f32[1,128], index: 4, kind: input, shape index: {}]   ;;  %s1160_s5 = inlined_call_operand.vmem [shape: f32[128,128], index: 5, kind: input, shape index: {}]   ;;  %s1161_s6 = inlined_call_operand.vmem [shape: f32[1,128], index: 6, kind: input, shape index: {}]   ;;  %s1162_s7 = inlined_call_operand.hbm [shape: f32[8,128], index: 7, kind: output, shape index: {}]  }
   0x1   :  { %v29_v0 = vld [vmem:[%s1156_s1 + $0x8] sm:$0xff]  ;;  %v28_v2 = vld [vmem:[%s1156_s1] sm:$0xff]  ;;  %134 = vmatprep.mubr.f32.mxu1 %v794_v7  ;;  %v31_v12 = vld [vmem:[%s1156_s1 + $0x18] sm:$0xff] }
   0x2   :  { %v33_v1 = vld [vmem:[%s1156_s1 + $0x28] sm:$0xff]  ;;  %v32_v4 = vld [vmem:[%s1156_s1 + $0x20] sm:$0xff]  ;;  %v35_v13 = vld [vmem:[%s1156_s1 + $0x38] sm:$0xff] }
   0x3   :  { %v662_v3 = vpack.c.bf16 %v33_v1, %v29_v0  ;;  %v37_v5 = vld [vmem:[%s1156_s1 + $0x48] sm:$0xff]  ;;  %v664_v8 = vpack.c.bf16 %v32_v4, %v28_v2  ;;  %v36_v10 = vld [vmem:[%s1156_s1 + $0x40] sm:$0xff]  ;;  %v30_v15 = vld [vmem:[%s1156_s1 + $0x10] sm:$0xff]  ;;  %v670_v17 = vpack.c.bf16 %v35_v13, %v31_v12 }
   0x4   :  { %v41_v6 = vld [vmem:[%s1156_s1 + $0x68] sm:$0xff]  ;;  %v40_v11 = vld [vmem:[%s1156_s1 + $0x60] sm:$0xff]  ;;  %v34_v16 = vld [vmem:[%s1156_s1 + $0x30] sm:$0xff] }
   0x5   :  { %v666_v9 = vpack.c.bf16 %v41_v6, %v37_v5  ;;  %663 = vmatprep.subr.bf16.mxu1 %v662_v3  ;;  %v668_v14 = vpack.c.bf16 %v40_v11, %v36_v10  ;;  %v39_v18 = vld [vmem:[%s1156_s1 + $0x58] sm:$0xff]  ;;  %v232_v20 = vld [vmem:[%s1158_s3 + $0x80] sm:$0xff]  ;;  %v233_v22 = vld [vmem:[%s1158_s3 + $0x88] sm:$0xff]  ;;  %v672_v30 = vpack.c.bf16 %v34_v16, %v30_v15 }
   0x6   :  { %665 = vmatpush1.bf16.msra.mxu1 %v664_v8  ;;  %v43_v19 = vld [vmem:[%s1156_s1 + $0x78] sm:$0xff]  ;;  %v27_v21 = vld [vmem:[%s1155_s0] sm:$0xff]  ;;  %v217_v24 = vld [vmem:[%s1158_s3 + $0x8] sm:$0xff]  ;;  %v678_v25 = vpack.c.bf16 %v233_v22, %v232_v20 }
   0x7   :  { %667 = vmatprep.subr.bf16.mxu1 %v666_v9  ;;  %v216_v23 = vld [vmem:[%s1158_s3] sm:$0xff]  ;;  %v234_v27 = vld [vmem:[%s1158_s3 + $0x90] sm:$0xff]  ;;  %v235_v28 = vld [vmem:[%s1158_s3 + $0x98] sm:$0xff]  ;;  %v674_v35 = vpack.c.bf16 %v43_v19, %v39_v18 }
   0x8   :  { %v680_v26 = vpack.c.bf16 %v217_v24, %v216_v23  ;;  %v218_v29 = vld [vmem:[%s1158_s3 + $0x10] sm:$0xff]  ;;  %v682_v31 = vpack.c.bf16 %v235_v28, %v234_v27  ;;  %v219_v32 = vld [vmem:[%s1158_s3 + $0x18] sm:$0xff]  ;;  %v236_v33 = vld [vmem:[%s1158_s3 + $0xa0] sm:$0xff]  ;;  %679 = vmatprep.subr.bf16.mxu0 %v678_v25 }
   0x9   :  { %v237_v34 = vld [vmem:[%s1158_s3 + $0xa8] sm:$0xff]  ;;  %v38_v36 = vld [vmem:[%s1156_s1 + $0x50] sm:$0xff]  ;;  %v684_v38 = vpack.c.bf16 %v219_v32, %v218_v29  ;;  %v264_v39 = vld [vmem:[%s1158_s3 + $0x180] sm:$0xff] }
   0xa   :  { %669 = vmatpush1.bf16.msra.mxu1 %v668_v14  ;;  %v42_v37 = vld [vmem:[%s1156_s1 + $0x70] sm:$0xff]  ;;  %681 = vmatpush3.bf16.msra.mxu0 %v680_v26  ;;  %v265_v40 = vld [vmem:[%s1158_s3 + $0x188] sm:$0xff]  ;;  %v686_v41 = vpack.c.bf16 %v237_v34, %v236_v33  ;;  %v220_v42 = vld [vmem:[%s1158_s3 + $0x20] sm:$0xff] }
   0xb   :  { %671 = vmatprep.subr.bf16.mxu1 %v670_v17  ;;  %683 = vmatprep.subr.bf16.mxu0 %v682_v31  ;;  %v221_v43 = vld [vmem:[%s1158_s3 + $0x28] sm:$0xff]  ;;  %v676_v44 = vpack.c.bf16 %v42_v37, %v38_v36  ;;  %v238_v45 = vld [vmem:[%s1158_s3 + $0xb0] sm:$0xff]  ;;  %v239_v46 = vld [vmem:[%s1158_s3 + $0xb8] sm:$0xff]  ;;  %v710_v47 = vpack.c.bf16 %v265_v40, %v264_v39 }
   0xc   :  { %v248_v48 = vld [vmem:[%s1158_s3 + $0x100] sm:$0xff]  ;;  %v249_v49 = vld [vmem:[%s1158_s3 + $0x108] sm:$0xff]  ;;  %v688_v50 = vpack.c.bf16 %v221_v43, %v220_v42  ;;  %v266_v51 = vld [vmem:[%s1158_s3 + $0x190] sm:$0xff]  ;;  %v690_v53 = vpack.c.bf16 %v239_v46, %v238_v45 }
   0xd   :  { %536 = vmatmul.mubr.msk.f32.vlgmr.msra.gmra.mrb[0].mxu1 %vm66_vm0, %v27_v21  ;;  %v267_v52 = vld [vmem:[%s1158_s3 + $0x198] sm:$0xff]  ;;  %v222_v54 = vld [vmem:[%s1158_s3 + $0x30] sm:$0xff]  ;;  %v712_v56 = vpack.c.bf16 %v249_v49, %v248_v48  ;;  %v240_v57 = vld [vmem:[%s1158_s3 + $0xc0] sm:$0xff] }
   0xe   :  { %673 = vmatpush1.bf16.msra.mxu1 %v672_v30  ;;  %205 = vmatprep.mubr.f32.mxu1 %v794_v7  ;;  %v223_v55 = vld [vmem:[%s1158_s3 + $0x38] sm:$0xff]  ;;  %v241_v58 = vld [vmem:[%s1158_s3 + $0xc8] sm:$0xff]  ;;  %v714_v59 = vpack.c.bf16 %v267_v52, %v266_v51  ;;  %v250_v60 = vld [vmem:[%s1158_s3 + $0x110] sm:$0xff] }
   0xf   :  { %675 = vmatprep.subr.bf16.mxu1 %v674_v35  ;;  %685 = vmatpush3.bf16.msra.mxu0 %v684_v38  ;;  %v251_v61 = vld [vmem:[%s1158_s3 + $0x118] sm:$0xff]  ;;  %v692_v62 = vpack.c.bf16 %v223_v55, %v222_v54  ;;  %v268_v63 = vld [vmem:[%s1158_s3 + $0x1a0] sm:$0xff]  ;;  %v269_v0 = vld [vmem:[%s1158_s3 + $0x1a8] sm:$0xff]  ;;  %v694_v1 = vpack.c.bf16 %v241_v58, %v240_v57 }
  0x10   :  { %687 = vmatprep.subr.bf16.mxu0 %v686_v41  ;;  %v224_v2 = vld [vmem:[%s1158_s3 + $0x40] sm:$0xff]  ;;  %v225_v3 = vld [vmem:[%s1158_s3 + $0x48] sm:$0xff]  ;;  %v716_v4 = vpack.c.bf16 %v251_v61, %v250_v60  ;;  %v242_v5 = vld [vmem:[%s1158_s3 + $0xd0] sm:$0xff] }
  0x11   :  { %v243_v6 = vld [vmem:[%s1158_s3 + $0xd8] sm:$0xff] }
  0x12   :  { %677 = vmatpush1.bf16.msra.mxu1 %v676_v44 }
  0x13   :  { %711 = vmatprep.subr.bf16.mxu1 %v710_v47  ;;  %689 = vmatpush3.bf16.msra.mxu0 %v688_v50 }
  0x14   :  { %691 = vmatprep.subr.bf16.mxu0 %v690_v53 }
  0x15   :  { %537 = vmatmul.mubr.msk.f32.vlgmr.msra.gmra.mrb[2].mxu1 %vm66_vm0, %v27_v21 }
  0x16   :  { %713 = vmatpush3.bf16.msra.mxu1 %v712_v56 }
  0x17   :  { %12 = vsyncpa [#allocation3], 0  ;;  %715 = vmatprep.subr.bf16.mxu1 %v714_v59  ;;  %v718_v8 = vpack.c.bf16 %v269_v0, %v268_v63  ;;  %v252_v9 = vld [vmem:[%s1158_s3 + $0x120] sm:$0xff]  ;;  %v253_v10 = vld [vmem:[%s1158_s3 + $0x128] sm:$0xff]  ;;  %693 = vmatpush3.bf16.msra.mxu0 %v692_v62  ;;  %v696_v11 = vpack.c.bf16 %v225_v3, %v224_v2  ;;  %v698_v14 = vpack.c.bf16 %v243_v6, %v242_v5  ;;  %v795_v59 = vmov 0.0|0.0   ;;  %s797_s22 = smov [#allocation2]  }
  0x18   :  { %v270_v12 = vld [vmem:[%s1158_s3 + $0x1b0] sm:$0xff]  ;;  %v271_v13 = vld [vmem:[%s1158_s3 + $0x1b8] sm:$0xff]  ;;  %695 = vmatprep.subr.bf16.mxu0 %v694_v1  ;;  %v720_v17 = vpack.c.bf16 %v253_v10, %v252_v9  ;;  %v244_v18 = vld [vmem:[%s1158_s3 + $0xe0] sm:$0xff]  ;;  %v46_v60 = vlaneseq  ;;  %vm796_vm1 = vmmov 0   ;;  %s528_s23 = sshll.u32 %s797_s22, 4  ;;  %s529_s23 = int_to_ptr.vmem [resolvable:$true] %s528_s23 }
  0x19   :  { %v226_v15 = vld [vmem:[%s1158_s3 + $0x50] sm:$0xff]  ;;  %v227_v16 = vld [vmem:[%s1158_s3 + $0x58] sm:$0xff]  ;;  %v245_v19 = vld [vmem:[%s1158_s3 + $0xe8] sm:$0xff]  ;;  %v722_v20 = vpack.c.bf16 %v271_v13, %v270_v12  ;;  %s770_s24 = scalar_lea.vmem %s529_s23, 128  ;;  %p775_p1 = scmp.lt.s32.totalorder %s529_s23, %s529_s23 }
  0x1a   :  { %717 = vmatpush3.bf16.msra.mxu1 %v716_v4  ;;  %v254_v21 = vld [vmem:[%s1158_s3 + $0x130] sm:$0xff]  ;;  %v255_v22 = vld [vmem:[%s1158_s3 + $0x138] sm:$0xff]  ;;  %v700_v23 = vpack.c.bf16 %v227_v16, %v226_v15  ;;  %v272_v24 = vld [vmem:[%s1158_s3 + $0x1c0] sm:$0xff]  ;;  %v702_v26 = vpack.c.bf16 %v245_v19, %v244_v18  ;;  %v47_v61 = vshrl.u32 %v46_v60, 7  ;;  %p771_p0 = scmp.ne.s32.totalorder %s529_s23, %s770_s24  ;;  %p776_p2 = scmp.lt.s32.totalorder %s770_s24, %s770_s24 }
  0x1b   :  { %719 = vmatprep.subr.bf16.mxu1 %v718_v8  ;;  %697 = vmatpush3.bf16.msra.mxu0 %v696_v11  ;;  %v273_v25 = vld [vmem:[%s1158_s3 + $0x1c8] sm:$0xff]  ;;  %v724_v27 = vpack.c.bf16 %v255_v22, %v254_v21  ;;  %v228_v29 = vld [vmem:[%s1158_s3 + $0x60] sm:$0xff]  ;;  %v246_v35 = vld [vmem:[%s1158_s3 + $0xf0] sm:$0xff] }
  0x1c   :  { %699 = vmatprep.subr.bf16.mxu0 %v698_v14  ;;  %v726_v28 = vpack.c.bf16 %v273_v25, %v272_v24  ;;  %v229_v30 = vld [vmem:[%s1158_s3 + $0x68] sm:$0xff]  ;;  %v256_v31 = vld [vmem:[%s1158_s3 + $0x140] sm:$0xff]  ;;  %v247_v36 = vld [vmem:[%s1158_s3 + $0xf8] sm:$0xff]  ;;  %v48_v62 = vsub.s32 0, %v47_v61  ;;  %v52_v0 = vsub.s32 1, %v47_v61  ;;  %v56_v6 = vsub.s32 2, %v47_v61  ;;  %p777_p3 = por %p776_p2, %p775_p1 }
  0x1d   :  { %v704_v32 = vpack.c.bf16 %v229_v30, %v228_v29  ;;  %v257_v33 = vld [vmem:[%s1158_s3 + $0x148] sm:$0xff]  ;;  %v274_v37 = vld [vmem:[%s1158_s3 + $0x1d0] sm:$0xff]  ;;  %v706_v38 = vpack.c.bf16 %v247_v36, %v246_v35  ;;  %v275_v39 = vld [vmem:[%s1158_s3 + $0x1d8] sm:$0xff]  ;;  %v60_v11 = vsub.s32 3, %v47_v61 }
  0x1e   :  { %721 = vmatpush3.bf16.msra.mxu1 %v720_v17  ;;  %v728_v34 = vpack.c.bf16 %v257_v33, %v256_v31  ;;  %v230_v40 = vld [vmem:[%s1158_s3 + $0x70] sm:$0xff]  ;;  %v231_v41 = vld [vmem:[%s1158_s3 + $0x78] sm:$0xff]  ;;  %v730_v42 = vpack.c.bf16 %v275_v39, %v274_v37  ;;  %v276_v47 = vld [vmem:[%s1158_s3 + $0x1e0] sm:$0xff]  ;;  %p778_p4 = pnand %p777_p3, %p771_p0 }
  0x1f   :  { %723 = vmatprep.subr.bf16.mxu1 %v722_v20  ;;  %701 = vmatpush3.bf16.msra.mxu0 %v700_v23  ;;  %v708_v43 = vpack.c.bf16 %v231_v41, %v230_v40  ;;  %v258_v44 = vld [vmem:[%s1158_s3 + $0x150] sm:$0xff]  ;;  %v259_v45 = vld [vmem:[%s1158_s3 + $0x158] sm:$0xff]  ;;  %v277_v48 = vld [vmem:[%s1158_s3 + $0x1e8] sm:$0xff] }
  0x20   :  { %703 = vmatprep.subr.bf16.mxu0 %v702_v26  ;;  %v732_v46 = vpack.c.bf16 %v259_v45, %v258_v44  ;;  %v734_v49 = vpack.c.bf16 %v277_v48, %v276_v47  ;;  %v260_v50 = vld [vmem:[%s1158_s3 + $0x160] sm:$0xff]  ;;  %v261_v51 = vld [vmem:[%s1158_s3 + $0x168] sm:$0xff]  ;;  %v278_v53 = vld [vmem:[%s1158_s3 + $0x1f0] sm:$0xff] }
  0x21   :  { %v736_v52 = vpack.c.bf16 %v261_v51, %v260_v50  ;;  %v279_v54 = vld [vmem:[%s1158_s3 + $0x1f8] sm:$0xff]  ;;  %v262_v56 = vld [vmem:[%s1158_s3 + $0x170] sm:$0xff]  ;;  %v44_v63 = vld [vmem:[%s1157_s2] sm:$0xf] }
  0x22   :  { %725 = vmatpush3.bf16.msra.mxu1 %v724_v27  ;;  %v738_v55 = vpack.c.bf16 %v279_v54, %v278_v53  ;;  %v263_v57 = vld [vmem:[%s1158_s3 + $0x178] sm:$0xff]  ;;  %v49_v1 = vrot.slane %v44_v63, %v48_v62  ;;  %v53_v2 = vrot.slane %v44_v63, %v52_v0  ;;  %v428_v8 = vld [vmem:[%s1160_s5] sm:$0xff]  ;;  %v429_v9 = vld [vmem:[%s1160_s5 + $0x8] sm:$0xff]  ;;  %v57_v15 = vrot.slane %v44_v63, %v56_v6 }
  0x23   :  { %727 = vmatprep.subr.bf16.mxu1 %v726_v28  ;;  %705 = vmatpush3.bf16.msra.mxu0 %v704_v32  ;;  %v740_v58 = vpack.c.bf16 %v263_v57, %v262_v56  ;;  %v743_v14 = vpack.c.bf16 %v429_v9, %v428_v8  ;;  %v430_v16 = vld [vmem:[%s1160_s5 + $0x10] sm:$0xff]  ;;  %v431_v17 = vld [vmem:[%s1160_s5 + $0x18] sm:$0xff]  ;;  %v61_v18 = vrot.slane %v44_v63, %v60_v11  ;;  %v432_v23 = vld [vmem:[%s1160_s5 + $0x20] sm:$0xff] }
  0x24   :  { %707 = vmatprep.subr.bf16.mxu0 %v706_v38  ;;  %v746_v20 = vpack.c.bf16 %v431_v17, %v430_v16  ;;  %v433_v24 = vld [vmem:[%s1160_s5 + $0x28] sm:$0xff]  ;;  %v434_v29 = vld [vmem:[%s1160_s5 + $0x30] sm:$0xff]  ;;  %v435_v30 = vld [vmem:[%s1160_s5 + $0x38] sm:$0xff] }
  0x25   :  { %v749_v27 = vpack.c.bf16 %v433_v24, %v432_v23  ;;  %v752_v31 = vpack.c.bf16 %v435_v30, %v434_v29  ;;  %v436_v32 = vld [vmem:[%s1160_s5 + $0x40] sm:$0xff]  ;;  %v437_v33 = vld [vmem:[%s1160_s5 + $0x48] sm:$0xff]  ;;  %v438_v35 = vld [vmem:[%s1160_s5 + $0x50] sm:$0xff] }
  0x26   :  { %729 = vmatpush3.bf16.msra.mxu1 %v728_v34  ;;  %v755_v34 = vpack.c.bf16 %v437_v33, %v436_v32  ;;  %v439_v36 = vld [vmem:[%s1160_s5 + $0x58] sm:$0xff]  ;;  %v440_v38 = vld [vmem:[%s1160_s5 + $0x60] sm:$0xff]  ;;  %v441_v39 = vld [vmem:[%s1160_s5 + $0x68] sm:$0xff] }
  0x27   :  { %731 = vmatprep.subr.bf16.mxu1 %v730_v42  ;;  %709 = vmatpush3.bf16.msra.mxu0 %v708_v43  ;;  %v758_v37 = vpack.c.bf16 %v439_v36, %v438_v35  ;;  %v761_v40 = vpack.c.bf16 %v441_v39, %v440_v38  ;;  %v442_v41 = vld [vmem:[%s1160_s5 + $0x70] sm:$0xff]  ;;  %v443_v42 = vld [vmem:[%s1160_s5 + $0x78] sm:$0xff]  ;;  %v538_v47 = vld [vmem:[%s1159_s4] ss:$0 sm:$0xff] }
  0x28   :  { %742 = vmatprep.subr.bf16.mxu0 %v795_v59  ;;  %v764_v43 = vpack.c.bf16 %v443_v42, %v442_v41  ;;  %v539_v54 = vld [vmem:[%s1161_s6] ss:$0 sm:$0xff] }
  0x2a   :  { %733 = vmatpush3.bf16.msra.mxu1 %v732_v46 }
  0x2b   :  { %735 = vmatprep.subr.bf16.mxu1 %v734_v49 }
  0x2e   :  { %737 = vmatpush3.bf16.msra.mxu1 %v736_v52 }
  0x2f   :  { %739 = vmatprep.subr.bf16.mxu1 %v738_v55 }
  0x32   :  { %741 = vmatpush3.bf16.msra.mxu1 %v740_v58 }
  0xe0   :  { %v136_v3 = vpop.f32.mrb[0].mxu1 }
  0xe1   :  { %v137_v4 = vadd.f32 %v136_v3, %v49_v1  ;;  %v138_v5 = vpop.f32.mrb[1].mxu1 }
  0xe2   :  { %v139_v10 = vadd.f32 %v138_v5, %v53_v2 }
  0xe3   :  { %v212_v12 = vmax.f32 %v137_v4, 0.0 }
  0xe4   :  { %v213_v13 = vmax.f32 %v139_v10, 0.0 }
  0xe6   :  { %351 = vmatprep.mubr.f32.mxu0 %v213_v13 }
  0xe7   :  { %352 = vmatmul.mubr.f32.vlgmr.msra.gmra.mrb[0].mxu0 %v212_v12 }
  0xe8   :  { %v207_v19 = vpop.f32.mrb[2].mxu1  ;;  %744 = vmatpush3.bf16.msra.mxu0 %v743_v14  ;;  %659 = vmatprep.mubr.msk.f32.mxu0 %vm796_vm1, %v794_v7 }
  0xe9   :  { %v208_v21 = vadd.f32 %v207_v19, %v57_v15  ;;  %v209_v22 = vpop.f32.mrb[3].mxu1  ;;  %745 = vmatprep.subr.bf16.mxu0 %v795_v59 }
  0xea   :  { %v210_v25 = vadd.f32 %v209_v22, %v61_v18 }
  0xeb   :  { %v214_v28 = vmax.f32 %v208_v21, 0.0 }
  0xec   :  { %v215_v26 = vmax.f32 %v210_v25, 0.0  ;;  %747 = vmatpush3.bf16.msra.mxu0 %v746_v20 }
  0xed   :  { %748 = vmatprep.subr.bf16.mxu0 %v795_v59 }
  0xee   :  { %421 = vmatprep.mubr.f32.mxu1 %v215_v26 }
  0xef   :  { %422 = vmatmul.mubr.f32.vlgmr.msra.gmra.mrb[4].mxu1 %v214_v28 }
  0xf0   :  { %750 = vmatpush3.bf16.msra.mxu0 %v749_v27 }
  0xf1   :  { %751 = vmatprep.subr.bf16.mxu0 %v795_v59 }
  0xf4   :  { %753 = vmatpush3.bf16.msra.mxu0 %v752_v31 }
  0xf5   :  { %754 = vmatprep.subr.bf16.mxu0 %v795_v59 }
  0xf8   :  { %756 = vmatpush3.bf16.msra.mxu0 %v755_v34 }
  0xf9   :  { %757 = vmatprep.subr.bf16.mxu0 %v795_v59 }
  0xfc   :  { %759 = vmatpush3.bf16.msra.mxu0 %v758_v37 }
  0xfd   :  { %760 = vmatprep.subr.bf16.mxu0 %v795_v59 }
 0x100   :  { %762 = vmatpush3.bf16.msra.mxu0 %v761_v40 }
 0x101   :  { %763 = vmatprep.subr.bf16.mxu0 %v795_v59 }
 0x104   :  { %765 = vmatpush3.bf16.msra.mxu0 %v764_v43 }
 0x1ba   :  { %v572_v44 = vpop.f32.mrb[0].mxu0 }
 0x1bb   :  { %v573_v45 = vpop.f32.mrb[1].mxu0 }
 0x1bc   :  { %v574_v46 = vadd.f32 %v573_v45, %v572_v44 }
 0x1be   :  { %v354_v50 = vadd.f32 %v574_v46, %v538_v47 }
 0x1c2   :  { %v607_v48 = vpop.f32.mrb[4].mxu1 }
 0x1c3   :  { %v608_v49 = vpop.f32.mrb[5].mxu1 }
 0x1c4   :  { %v609_v51 = vadd.f32 %v608_v49, %v607_v48 }
 0x1c6   :  { %v424_v52 = vadd.f32 %v609_v51, %v354_v50 }
 0x1c8   :  { %v427_v53 = vmax.f32 %v424_v52, 0.0 }
 0x1ca   :  { %660 = vmatmul.mubr.f32.vlgmr.msra.gmra.mrb[2].mxu0 %v427_v53 }
 0x29d   :  { %v517_v7 = vpop.f32.mrb[2].mxu0 }
 0x29e   :  { %v518_v55 = vadd.f32 %v539_v54, %v517_v7  ;;  %v661_v56 = vpop.f32.mrb[3].mxu0 }
 0x2a0   :  { %521 = vst [vmem:[#allocation2] sm:$0xff] %v518_v55 }
 0x2a1   :  { %781 = shalt.err (!%p778_p4)
}
 0x2a2   :  { %s782_s26 = scalar_lea.hbm %s1162_s7, 128 }
 0x2a3   :  { %p783_p5 = scmp.ne.s32.totalorder %s1162_s7, %s782_s26  ;;  %p786_p6 = scmp.lt.u32.totalorder %s782_s26, %s1162_s7 }
 0x2a5   :  { %p788_p7 = pnand %p786_p6, %p783_p5 }
 0x2a7   :  { %791 = shalt.err (!%p788_p7)
}
 0x2a8   :  { %531 = dma.vmem_to_hbm [thread:$0]  %s529_s23, 128, %s1162_s7, [#allocation3]  }
 0x2a9   :  { %792 = dma.done.wait [#allocation3], 128  }
 0x2aa   :  { %793 = vsyncadd [#allocation3], 4294967168 }
 0x2ab   :  { %535 = vsyncpa [#allocation3], 1 }

</bundles_post_ra>
